<compile_context>
chip_gen: v7x
topology: tpu7x:2x2x1
jax: 0.10.0
libtpu: 0.0.40
codegen_flags: <defaults>
</compile_context>

<pallas_src>
import functools

import jax
import jax.numpy as jnp
from jax import lax
from jax.experimental import pallas as pl
from jax.experimental.pallas import tpu as pltpu

N_EMBED = 32
N_HEAD = 4
HEAD_SIZE = N_EMBED // N_HEAD
BLOCK_SIZE = 8          # max sequence length (size of the tril buffer)
LN_EPS = 1e-5
NEG_INF = -1e30         # finite large negative for masking (diagonal always unmasked)


def _normalize(x):
    """Raw LayerNorm normalization (affine folded into downstream weights)."""
    mu = jnp.mean(x, axis=-1, keepdims=True)
    xc = x - mu
    var = jnp.mean(xc * xc, axis=-1, keepdims=True)
    return xc * lax.rsqrt(var + LN_EPS)


def block_kernel(x_ref,
                 wqkv_ref, bqkv_ref, wproj_ref, bproj_ref,
                 w1_ref, b1_ref, w2_ref, b2_ref,
                 o_ref, *, seq_len, n_head):
    x = x_ref[...]                                  # (Rb, C): Rb = batch_block * seq_len rows
    Rb, C = x.shape
    hs = C // n_head
    bb = Rb // seq_len

    # ---- LayerNorm 1 (gamma/beta folded into wqkv/bqkv) ----
    n1 = _normalize(x)

    # ---- fused Q/K/V projection (single MXU push; Q columns pre-scaled by C**-0.5) ----
    qkv = jnp.dot(n1, wqkv_ref[...], preferred_element_type=jnp.float32) + bqkv_ref[...]  # (Rb, 3C)

    # Small (T, T) causal mask shared by all packed sequences and heads.
    row = lax.broadcasted_iota(jnp.int32, (seq_len, seq_len), 0)
    col = lax.broadcasted_iota(jnp.int32, (seq_len, seq_len), 1)
    causal = (col <= row)[None]                     # (1, T, T)

    # ---- per-head attention, batched over the sequences packed in this block ----
    ovs = []
    for h in range(n_head):                         # static, unrolled loop over heads
        o0 = h * hs
        q = qkv[:, o0:o0 + hs].reshape(bb, seq_len, hs)
        k = qkv[:, C + o0:C + o0 + hs].reshape(bb, seq_len, hs)
        v = qkv[:, 2 * C + o0:2 * C + o0 + hs].reshape(bb, seq_len, hs)
        s = jnp.einsum("bqd,bkd->bqk", q, k,
                       preferred_element_type=jnp.float32)                # (bb, T, T)
        s = jnp.where(causal, s, NEG_INF)
        s = s - jnp.max(s, axis=-1, keepdims=True)
        p = jnp.exp(s)
        p = p * pl.reciprocal(jnp.sum(p, axis=-1, keepdims=True), approx=True)
        # TODO(synk): attention-weight dropout omitted (eval mode / DROPOUT = 0)
        ovs.append(jnp.einsum("bqk,bkd->bqd", p, v,
                              preferred_element_type=jnp.float32))        # (bb, T, hs)

    # Concatenate heads (head h -> columns [h*hs, (h+1)*hs)) and project with ONE matmul.
    heads = jnp.concatenate(ovs, axis=-1).reshape(Rb, C)                  # (Rb, C)
    attn = jnp.dot(heads, wproj_ref[...],
                   preferred_element_type=jnp.float32) + bproj_ref[...]   # (Rb, C)

    x1 = x + attn                                   # residual 1

    # ---- LayerNorm 2 (gamma/beta folded into w1/b1) + FeedForward ----
    n2 = _normalize(x1)
    h1 = jnp.maximum(
        jnp.dot(n2, w1_ref[...], preferred_element_type=jnp.float32) + b1_ref[...], 0.0)
    ff = jnp.dot(h1, w2_ref[...], preferred_element_type=jnp.float32) + b2_ref[...]
    # TODO(synk): FFN dropout omitted (eval mode / DROPOUT = 0)

    o_ref[...] = (x1 + ff).astype(o_ref.dtype)      # residual 2


# ---------------- one-time weight preparation (hoisted out of the forward path) ----------------
def prepare_block_params(params):
    H, C, hs = params["wq"].shape
    scale = C ** (-0.5)                             # full-embedding-dim scale (reference quirk)

    def heads_to_cols(w):                           # (H, C, hs) -> (C, H*hs)
        return jnp.transpose(w, (1, 0, 2)).reshape(C, H * hs)

    wqkv_raw = jnp.concatenate([heads_to_cols(params["wq"]),
                                heads_to_cols(params["wk"]),
                                heads_to_cols(params["wv"])], axis=-1)    # (C, 3C)
    # Fold LN1 affine:  LN1(x) @ W = norm(x) @ (g[:,None]*W) + (b @ W)
    g1 = params["ln1_g"].reshape(C, 1)
    b1 = params["ln1_b"].reshape(1, C)
    col_scale = jnp.concatenate([jnp.full((C,), scale, jnp.float32),
                                 jnp.ones((2 * C,), jnp.float32)])        # scale only Q columns
    wqkv = (g1 * wqkv_raw) * col_scale[None, :]                           # (C, 3C)
    bqkv = (b1 @ wqkv_raw) * col_scale[None, :]                           # (1, 3C)

    # Fold LN2 affine into the first FFN linear.
    g2 = params["ln2_g"].reshape(C, 1)
    b2 = params["ln2_b"].reshape(1, C)
    w1 = g2 * params["w1"]                                                # (C, 4C)
    b1f = params["b1"] + b2 @ params["w1"]                                # (1, 4C)

    return {
        "wqkv": wqkv, "bqkv": bqkv,
        "wproj": params["wproj"], "bproj": params["bproj"],
        "w1": w1, "b1": b1f,
        "w2": params["w2"], "b2": params["b2"],
        "n_head": H,
    }


def _num_tensorcores():
    """Best-effort TensorCore-per-device count (perf-only; any answer is correct)."""
    try:
        info = pltpu.get_tpu_info()
        for attr in ("num_cores", "num_tensor_cores", "tensor_cores_per_chip",
                     "cores_per_chip"):
            val = getattr(info, attr, None)
            if val:
                return int(val)
    except Exception:
        pass
    try:
        kind = jax.devices()[0].device_kind.lower()
        if any(tag in kind for tag in ("v5e", "v5 lite", "v6e", "v6 lite")):
            return 1                                # single-TC chips
    except Exception:
        pass
    return 2                                        # megacore-style (v4/v5p/v7x): 2 TCs


def _choose_batch_block(B, T, num_tc, target_rows=512):
    """Largest B-divisor whose block (a) obeys the sublane rule, (b) feeds every TC,
    (c) keeps rows-per-step near target_rows to amortize per-step overhead."""
    divisors = [d for d in range(1, B + 1) if B % d == 0]
    legal = [d for d in divisors if d == B or (d * T) % 8 == 0]

    def key(d):
        rows = d * T
        grid = B // d
        feeds_all_tcs = (grid % num_tc == 0)
        fits = rows <= max(target_rows, T)
        return (feeds_all_tcs, fits, rows)

    return max(legal, key=key)


def block_forward(x, fused, *, batch_block=None):
    B, T, C = x.shape
    H = fused["n_head"]

    if batch_block is None:
        batch_block = _choose_batch_block(B, T, _num_tensorcores())
    assert B % batch_block == 0
    n_blocks = B // batch_block
    rows_per_block = batch_block * T
    if n_blocks > 1:
        assert rows_per_block % 8 == 0, "partial blocks must satisfy the 8-sublane rule"

    weights = [fused["wqkv"], fused["bqkv"], fused["wproj"], fused["bproj"],
               fused["w1"], fused["b1"], fused["w2"], fused["b2"]]

    x2 = x.reshape(B * T, C)                        # fold batch+seq onto sublanes

    kernel = functools.partial(block_kernel, seq_len=T, n_head=H)

    def wspec(w):
        nd = w.ndim
        # constant block index -> Pallas keeps the (tiny) weight resident, no re-DMA per step
        return pl.BlockSpec(w.shape, lambda i, _nd=nd: (0,) * _nd)

    out2 = pl.pallas_call(
        kernel,
        out_shape=jax.ShapeDtypeStruct((B * T, C), x.dtype),
        grid_spec=pltpu.PrefetchScalarGridSpec(
            num_scalar_prefetch=0,
            grid=(n_blocks,),
            in_specs=[pl.BlockSpec((rows_per_block, C), lambda i: (i, 0))]
                     + [wspec(w) for w in weights],
            out_specs=pl.BlockSpec((rows_per_block, C), lambda i: (i, 0)),
        ),
        compiler_params=pltpu.CompilerParams(dimension_semantics=("parallel",)),
    )(x2, *weights)
    return out2.reshape(B, T, C)


# ---------------- pure-JAX reference (for correctness check) ----------------
def _layer_norm_ref(x, gamma, beta):
    mean = jnp.mean(x, axis=-1, keepdims=True)
    var = jnp.mean((x - mean) ** 2, axis=-1, keepdims=True)
    return (x - mean) * lax.rsqrt(var + LN_EPS) * gamma + beta


def block_ref(x, params):
    B, T, C = x.shape
    ln1 = _layer_norm_ref(x, params["ln1_g"][0], params["ln1_b"][0])
    scale = C ** (-0.5)
    q = jnp.einsum("btc,hcd->bhtd", ln1, params["wq"])
    k = jnp.einsum("btc,hcd->bhtd", ln1, params["wk"])
    v = jnp.einsum("btc,hcd->bhtd", ln1, params["wv"])
    wei = jnp.einsum("bhtd,bhsd->bhts", q, k) * scale
    mask = jnp.tril(jnp.ones((T, T), dtype=bool))
    wei = jnp.where(mask[None, None], wei, -jnp.inf)
    p = jax.nn.softmax(wei, axis=-1)
    out = jnp.einsum("bhts,bhsd->bhtd", p, v)
    out = out.transpose(0, 2, 1, 3).reshape(B, T, C)
    out = out @ params["wproj"] + params["bproj"][0]
    x1 = x + out
    ln2 = _layer_norm_ref(x1, params["ln2_g"][0], params["ln2_b"][0])
    h1 = jnp.maximum(ln2 @ params["w1"] + params["b1"][0], 0.0)
    return x1 + (h1 @ params["w2"] + params["b2"][0])


def init_params(key, n_embed, n_head):
    hs = n_embed // n_head
    ks = jax.random.split(key, 10)
    s = 0.02
    return {
        "ln1_g": jnp.ones((1, n_embed), jnp.float32),
        "ln1_b": jnp.zeros((1, n_embed), jnp.float32),
        "wq": s * jax.random.normal(ks[0], (n_head, n_embed, hs), jnp.float32),
        "wk": s * jax.random.normal(ks[1], (n_head, n_embed, hs), jnp.float32),
        "wv": s * jax.random.normal(ks[2], (n_head, n_embed, hs), jnp.float32),
        "wproj": s * jax.random.normal(ks[3], (n_embed, n_embed), jnp.float32),
        "bproj": s * jax.random.normal(ks[4], (1, n_embed), jnp.float32),
        "ln2_g": jnp.ones((1, n_embed), jnp.float32),
        "ln2_b": jnp.zeros((1, n_embed), jnp.float32),
        "w1": s * jax.random.normal(ks[5], (n_embed, 4 * n_embed), jnp.float32),
        "b1": s * jax.random.normal(ks[6], (1, 4 * n_embed), jnp.float32),
        "w2": s * jax.random.normal(ks[7], (4 * n_embed, n_embed), jnp.float32),
        "b2": s * jax.random.normal(ks[8], (1, n_embed), jnp.float32),
    }


if __name__ == "__main__":
    B, T = 2, BLOCK_SIZE
    key = jax.random.PRNGKey(0)
    kx, kp = jax.random.split(key)
    x = jax.random.normal(kx, (B, T, N_EMBED), jnp.float32)
    params = init_params(kp, N_EMBED, N_HEAD)

    fused = prepare_block_params(params)            # one-time weight fusion/folding (init-time)
    fused = jax.tree_util.tree_map(
        lambda v: jax.block_until_ready(v) if isinstance(v, jax.Array) else v, fused)

    out = block_forward(x, fused)
    out = jax.block_until_ready(out)

    ref = jax.block_until_ready(block_ref(x, params))
    assert out.shape == (B, T, N_EMBED)
    assert jnp.allclose(out, ref, atol=2e-3, rtol=2e-3), "Pallas output mismatch vs reference"
    print("KERNEL_OK")
</pallas_src>

<mosaic_0001>
module attributes {stable_mosaic.version = 11 : i64} {
  func.func @block_kernel(%arg0: i32, %arg1: memref<8x32xf32, #tpu.memory_space<vmem>>, %arg2: memref<32x96xf32, #tpu.memory_space<vmem>>, %arg3: memref<1x96xf32, #tpu.memory_space<vmem>>, %arg4: memref<32x32xf32, #tpu.memory_space<vmem>>, %arg5: memref<1x32xf32, #tpu.memory_space<vmem>>, %arg6: memref<32x128xf32, #tpu.memory_space<vmem>>, %arg7: memref<1x128xf32, #tpu.memory_space<vmem>>, %arg8: memref<128x32xf32, #tpu.memory_space<vmem>>, %arg9: memref<1x32xf32, #tpu.memory_space<vmem>>, %arg10: memref<8x32xf32, #tpu.memory_space<vmem>>) attributes {dimension_semantics = [#tpu.dimension_semantics<parallel>], iteration_bounds = array<i64: 2>, scalar_prefetch = 0 : i64, scratch_operands = 0 : i64, tpu.core_type = #tpu.core_type<tc>, window_params = [{transform_indices = @transform_0, window_bounds = array<i64: 8, 32>}, {pipeline_mode = #tpu.pipeline_mode<synchronous>, transform_indices = @transform_1, window_bounds = array<i64: 32, 96>}, {pipeline_mode = #tpu.pipeline_mode<synchronous>, transform_indices = @transform_2, window_bounds = array<i64: 1, 96>}, {pipeline_mode = #tpu.pipeline_mode<synchronous>, transform_indices = @transform_3, window_bounds = array<i64: 32, 32>}, {pipeline_mode = #tpu.pipeline_mode<synchronous>, transform_indices = @transform_4, window_bounds = array<i64: 1, 32>}, {pipeline_mode = #tpu.pipeline_mode<synchronous>, transform_indices = @transform_5, window_bounds = array<i64: 32, 128>}, {pipeline_mode = #tpu.pipeline_mode<synchronous>, transform_indices = @transform_6, window_bounds = array<i64: 1, 128>}, {pipeline_mode = #tpu.pipeline_mode<synchronous>, transform_indices = @transform_7, window_bounds = array<i64: 128, 32>}, {pipeline_mode = #tpu.pipeline_mode<synchronous>, transform_indices = @transform_8, window_bounds = array<i64: 1, 32>}, {transform_indices = @transform_9, window_bounds = array<i64: 8, 32>}]} {
    %c0 = arith.constant 0 : index
    %c0_0 = arith.constant 0 : index
    %0 = vector.load %arg1[%c0, %c0_0] : memref<8x32xf32, #tpu.memory_space<vmem>>, vector<8x32xf32>
    %cst = arith.constant dense<0.000000e+00> : vector<8xf32>
    %1 = vector.multi_reduction <add>, %0, %cst [1] : vector<8x32xf32> to vector<8xf32>
    %2 = vector.shape_cast %1 : vector<8xf32> to vector<8x1xf32>
    %cst_1 = arith.constant 3.200000e+01 : f32
    %3 = vector.broadcast %cst_1 : f32 to vector<8x1xf32>
    %4 = arith.divf %2, %3 : vector<8x1xf32>
    %5 = vector.broadcast %4 : vector<8x1xf32> to vector<8x32xf32>
    %6 = arith.subf %0, %5 : vector<8x32xf32>
    %7 = arith.mulf %6, %6 : vector<8x32xf32>
    %cst_2 = arith.constant dense<0.000000e+00> : vector<8xf32>
    %8 = vector.multi_reduction <add>, %7, %cst_2 [1] : vector<8x32xf32> to vector<8xf32>
    %9 = vector.shape_cast %8 : vector<8xf32> to vector<8x1xf32>
    %cst_3 = arith.constant 3.200000e+01 : f32
    %10 = vector.broadcast %cst_3 : f32 to vector<8x1xf32>
    %11 = arith.divf %9, %10 : vector<8x1xf32>
    %cst_4 = arith.constant 9.99999974E-6 : f32
    %12 = vector.broadcast %cst_4 : f32 to vector<8x1xf32>
    %13 = arith.addf %11, %12 : vector<8x1xf32>
    %14 = math.rsqrt %13 : vector<8x1xf32>
    %15 = vector.broadcast %14 : vector<8x1xf32> to vector<8x32xf32>
    %16 = arith.mulf %6, %15 : vector<8x32xf32>
    %c0_5 = arith.constant 0 : index
    %c0_6 = arith.constant 0 : index
    %17 = vector.load %arg2[%c0_5, %c0_6] : memref<32x96xf32, #tpu.memory_space<vmem>>, vector<32x96xf32>
    %cst_7 = arith.constant dense<0.000000e+00> : vector<8x96xf32>
    %18 = tpu.matmul %16, %17, %cst_7 {dimension_numbers = #tpu.dot_dimension_numbers<[1], [0], [0], [1], [0, 0, 1, 1], [], []>} : vector<8x32xf32>, vector<32x96xf32>, vector<8x96xf32> -> vector<8x96xf32>
    %c0_8 = arith.constant 0 : index
    %c0_9 = arith.constant 0 : index
    %19 = vector.load %arg3[%c0_8, %c0_9] : memref<1x96xf32, #tpu.memory_space<vmem>>, vector<1x96xf32>
    %20 = vector.broadcast %19 : vector<1x96xf32> to vector<8x96xf32>
    %21 = arith.addf %18, %20 : vector<8x96xf32>
    %22 = tpu.iota {dimensions = array<i32: 0>} : vector<8x8xi32>
    %23 = tpu.iota {dimensions = array<i32: 1>} : vector<8x8xi32>
    %24 = arith.cmpi sle, %23, %22 : vector<8x8xi32>
    %25 = vector.shape_cast %24 : vector<8x8xi1> to vector<1x8x8xi1>
    %26 = vector.extract_strided_slice %21 {offsets = [0, 0], sizes = [8, 8], strides = [1, 1]} : vector<8x96xf32> to vector<8x8xf32>
    %27 = vector.shape_cast %26 : vector<8x8xf32> to vector<1x8x8xf32>
    %28 = vector.extract_strided_slice %21 {offsets = [0, 32], sizes = [8, 8], strides = [1, 1]} : vector<8x96xf32> to vector<8x8xf32>
    %29 = vector.shape_cast %28 : vector<8x8xf32> to vector<1x8x8xf32>
    %30 = vector.extract_strided_slice %21 {offsets = [0, 64], sizes = [8, 8], strides = [1, 1]} : vector<8x96xf32> to vector<8x8xf32>
    %31 = vector.shape_cast %30 : vector<8x8xf32> to vector<1x8x8xf32>
    "tpu.trace_start"() <{level = 10 : i32, message = "bqd,bkd->bqk"}> : () -> ()
    %cst_10 = arith.constant dense<0.000000e+00> : vector<1x8x8xf32>
    %32 = tpu.matmul %27, %29, %cst_10 {dimension_numbers = #tpu.dot_dimension_numbers<[2], [2], [1], [1], [0, 0, 0, 1, 1, 1], [0], [0]>} : vector<1x8x8xf32>, vector<1x8x8xf32>, vector<1x8x8xf32> -> vector<1x8x8xf32>
    %cst_11 = arith.constant -1.000000e+30 : f32
    "tpu.trace_stop"() : () -> ()
    %33 = vector.broadcast %cst_11 : f32 to vector<1x8x8xf32>
    %34 = arith.select %25, %32, %33 : vector<1x8x8xi1>, vector<1x8x8xf32>
    %cst_12 = arith.constant dense<0xFF800000> : vector<1x8xf32>
    %35 = vector.multi_reduction <maximumf>, %34, %cst_12 [2] : vector<1x8x8xf32> to vector<1x8xf32>
    %36 = vector.shape_cast %35 : vector<1x8xf32> to vector<1x8x1xf32>
    %37 = vector.broadcast %36 : vector<1x8x1xf32> to vector<1x8x8xf32>
    %38 = arith.subf %34, %37 : vector<1x8x8xf32>
    %39 = math.exp %38 : vector<1x8x8xf32>
    %cst_13 = arith.constant dense<0.000000e+00> : vector<1x8xf32>
    %40 = vector.multi_reduction <add>, %39, %cst_13 [2] : vector<1x8x8xf32> to vector<1x8xf32>
    %41 = vector.shape_cast %40 : vector<1x8xf32> to vector<1x8x1xf32>
    %42 = tpu.reciprocal %41 {approx = true} : vector<1x8x1xf32> -> vector<1x8x1xf32>
    %43 = vector.broadcast %42 : vector<1x8x1xf32> to vector<1x8x8xf32>
    %44 = arith.mulf %39, %43 : vector<1x8x8xf32>
    "tpu.trace_start"() <{level = 10 : i32, message = "bqk,bkd->bqd"}> : () -> ()
    %cst_14 = arith.constant dense<0.000000e+00> : vector<1x8x8xf32>
    %45 = tpu.matmul %44, %31, %cst_14 {dimension_numbers = #tpu.dot_dimension_numbers<[2], [1], [1], [2], [0, 0, 0, 1, 1, 2], [0], [0]>} : vector<1x8x8xf32>, vector<1x8x8xf32>, vector<1x8x8xf32> -> vector<1x8x8xf32>
    "tpu.trace_stop"() : () -> ()
    %46 = vector.extract_strided_slice %21 {offsets = [0, 8], sizes = [8, 8], strides = [1, 1]} : vector<8x96xf32> to vector<8x8xf32>
    %47 = vector.shape_cast %46 : vector<8x8xf32> to vector<1x8x8xf32>
    %48 = vector.extract_strided_slice %21 {offsets = [0, 40], sizes = [8, 8], strides = [1, 1]} : vector<8x96xf32> to vector<8x8xf32>
    %49 = vector.shape_cast %48 : vector<8x8xf32> to vector<1x8x8xf32>
    %50 = vector.extract_strided_slice %21 {offsets = [0, 72], sizes = [8, 8], strides = [1, 1]} : vector<8x96xf32> to vector<8x8xf32>
    %51 = vector.shape_cast %50 : vector<8x8xf32> to vector<1x8x8xf32>
    "tpu.trace_start"() <{level = 10 : i32, message = "bqd,bkd->bqk"}> : () -> ()
    %cst_15 = arith.constant dense<0.000000e+00> : vector<1x8x8xf32>
    %52 = tpu.matmul %47, %49, %cst_15 {dimension_numbers = #tpu.dot_dimension_numbers<[2], [2], [1], [1], [0, 0, 0, 1, 1, 1], [0], [0]>} : vector<1x8x8xf32>, vector<1x8x8xf32>, vector<1x8x8xf32> -> vector<1x8x8xf32>
    %cst_16 = arith.constant -1.000000e+30 : f32
    "tpu.trace_stop"() : () -> ()
    %53 = vector.broadcast %cst_16 : f32 to vector<1x8x8xf32>
    %54 = arith.select %25, %52, %53 : vector<1x8x8xi1>, vector<1x8x8xf32>
    %cst_17 = arith.constant dense<0xFF800000> : vector<1x8xf32>
    %55 = vector.multi_reduction <maximumf>, %54, %cst_17 [2] : vector<1x8x8xf32> to vector<1x8xf32>
    %56 = vector.shape_cast %55 : vector<1x8xf32> to vector<1x8x1xf32>
    %57 = vector.broadcast %56 : vector<1x8x1xf32> to vector<1x8x8xf32>
    %58 = arith.subf %54, %57 : vector<1x8x8xf32>
    %59 = math.exp %58 : vector<1x8x8xf32>
    %cst_18 = arith.constant dense<0.000000e+00> : vector<1x8xf32>
    %60 = vector.multi_reduction <add>, %59, %cst_18 [2] : vector<1x8x8xf32> to vector<1x8xf32>
    %61 = vector.shape_cast %60 : vector<1x8xf32> to vector<1x8x1xf32>
    %62 = tpu.reciprocal %61 {approx = true} : vector<1x8x1xf32> -> vector<1x8x1xf32>
    %63 = vector.broadcast %62 : vector<1x8x1xf32> to vector<1x8x8xf32>
    %64 = arith.mulf %59, %63 : vector<1x8x8xf32>
    "tpu.trace_start"() <{level = 10 : i32, message = "bqk,bkd->bqd"}> : () -> ()
    %cst_19 = arith.constant dense<0.000000e+00> : vector<1x8x8xf32>
    %65 = tpu.matmul %64, %51, %cst_19 {dimension_numbers = #tpu.dot_dimension_numbers<[2], [1], [1], [2], [0, 0, 0, 1, 1, 2], [0], [0]>} : vector<1x8x8xf32>, vector<1x8x8xf32>, vector<1x8x8xf32> -> vector<1x8x8xf32>
    "tpu.trace_stop"() : () -> ()
    %66 = vector.extract_strided_slice %21 {offsets = [0, 16], sizes = [8, 8], strides = [1, 1]} : vector<8x96xf32> to vector<8x8xf32>
    %67 = vector.shape_cast %66 : vector<8x8xf32> to vector<1x8x8xf32>
    %68 = vector.extract_strided_slice %21 {offsets = [0, 48], sizes = [8, 8], strides = [1, 1]} : vector<8x96xf32> to vector<8x8xf32>
    %69 = vector.shape_cast %68 : vector<8x8xf32> to vector<1x8x8xf32>
    %70 = vector.extract_strided_slice %21 {offsets = [0, 80], sizes = [8, 8], strides = [1, 1]} : vector<8x96xf32> to vector<8x8xf32>
    %71 = vector.shape_cast %70 : vector<8x8xf32> to vector<1x8x8xf32>
    "tpu.trace_start"() <{level = 10 : i32, message = "bqd,bkd->bqk"}> : () -> ()
    %cst_20 = arith.constant dense<0.000000e+00> : vector<1x8x8xf32>
    %72 = tpu.matmul %67, %69, %cst_20 {dimension_numbers = #tpu.dot_dimension_numbers<[2], [2], [1], [1], [0, 0, 0, 1, 1, 1], [0], [0]>} : vector<1x8x8xf32>, vector<1x8x8xf32>, vector<1x8x8xf32> -> vector<1x8x8xf32>
    %cst_21 = arith.constant -1.000000e+30 : f32
    "tpu.trace_stop"() : () -> ()
    %73 = vector.broadcast %cst_21 : f32 to vector<1x8x8xf32>
    %74 = arith.select %25, %72, %73 : vector<1x8x8xi1>, vector<1x8x8xf32>
    %cst_22 = arith.constant dense<0xFF800000> : vector<1x8xf32>
    %75 = vector.multi_reduction <maximumf>, %74, %cst_22 [2] : vector<1x8x8xf32> to vector<1x8xf32>
    %76 = vector.shape_cast %75 : vector<1x8xf32> to vector<1x8x1xf32>
    %77 = vector.broadcast %76 : vector<1x8x1xf32> to vector<1x8x8xf32>
    %78 = arith.subf %74, %77 : vector<1x8x8xf32>
    %79 = math.exp %78 : vector<1x8x8xf32>
    %cst_23 = arith.constant dense<0.000000e+00> : vector<1x8xf32>
    %80 = vector.multi_reduction <add>, %79, %cst_23 [2] : vector<1x8x8xf32> to vector<1x8xf32>
    %81 = vector.shape_cast %80 : vector<1x8xf32> to vector<1x8x1xf32>
    %82 = tpu.reciprocal %81 {approx = true} : vector<1x8x1xf32> -> vector<1x8x1xf32>
    %83 = vector.broadcast %82 : vector<1x8x1xf32> to vector<1x8x8xf32>
    %84 = arith.mulf %79, %83 : vector<1x8x8xf32>
    "tpu.trace_start"() <{level = 10 : i32, message = "bqk,bkd->bqd"}> : () -> ()
    %cst_24 = arith.constant dense<0.000000e+00> : vector<1x8x8xf32>
    %85 = tpu.matmul %84, %71, %cst_24 {dimension_numbers = #tpu.dot_dimension_numbers<[2], [1], [1], [2], [0, 0, 0, 1, 1, 2], [0], [0]>} : vector<1x8x8xf32>, vector<1x8x8xf32>, vector<1x8x8xf32> -> vector<1x8x8xf32>
    "tpu.trace_stop"() : () -> ()
    %86 = vector.extract_strided_slice %21 {offsets = [0, 24], sizes = [8, 8], strides = [1, 1]} : vector<8x96xf32> to vector<8x8xf32>
    %87 = vector.shape_cast %86 : vector<8x8xf32> to vector<1x8x8xf32>
    %88 = vector.extract_strided_slice %21 {offsets = [0, 56], sizes = [8, 8], strides = [1, 1]} : vector<8x96xf32> to vector<8x8xf32>
    %89 = vector.shape_cast %88 : vector<8x8xf32> to vector<1x8x8xf32>
    %90 = vector.extract_strided_slice %21 {offsets = [0, 88], sizes = [8, 8], strides = [1, 1]} : vector<8x96xf32> to vector<8x8xf32>
    %91 = vector.shape_cast %90 : vector<8x8xf32> to vector<1x8x8xf32>
    "tpu.trace_start"() <{level = 10 : i32, message = "bqd,bkd->bqk"}> : () -> ()
    %cst_25 = arith.constant dense<0.000000e+00> : vector<1x8x8xf32>
    %92 = tpu.matmul %87, %89, %cst_25 {dimension_numbers = #tpu.dot_dimension_numbers<[2], [2], [1], [1], [0, 0, 0, 1, 1, 1], [0], [0]>} : vector<1x8x8xf32>, vector<1x8x8xf32>, vector<1x8x8xf32> -> vector<1x8x8xf32>
    %cst_26 = arith.constant -1.000000e+30 : f32
    "tpu.trace_stop"() : () -> ()
    %93 = vector.broadcast %cst_26 : f32 to vector<1x8x8xf32>
    %94 = arith.select %25, %92, %93 : vector<1x8x8xi1>, vector<1x8x8xf32>
    %cst_27 = arith.constant dense<0xFF800000> : vector<1x8xf32>
    %95 = vector.multi_reduction <maximumf>, %94, %cst_27 [2] : vector<1x8x8xf32> to vector<1x8xf32>
    %96 = vector.shape_cast %95 : vector<1x8xf32> to vector<1x8x1xf32>
    %97 = vector.broadcast %96 : vector<1x8x1xf32> to vector<1x8x8xf32>
    %98 = arith.subf %94, %97 : vector<1x8x8xf32>
    %99 = math.exp %98 : vector<1x8x8xf32>
    %cst_28 = arith.constant dense<0.000000e+00> : vector<1x8xf32>
    %100 = vector.multi_reduction <add>, %99, %cst_28 [2] : vector<1x8x8xf32> to vector<1x8xf32>
    %101 = vector.shape_cast %100 : vector<1x8xf32> to vector<1x8x1xf32>
    %102 = tpu.reciprocal %101 {approx = true} : vector<1x8x1xf32> -> vector<1x8x1xf32>
    %103 = vector.broadcast %102 : vector<1x8x1xf32> to vector<1x8x8xf32>
    %104 = arith.mulf %99, %103 : vector<1x8x8xf32>
    "tpu.trace_start"() <{level = 10 : i32, message = "bqk,bkd->bqd"}> : () -> ()
    %cst_29 = arith.constant dense<0.000000e+00> : vector<1x8x8xf32>
    %105 = tpu.matmul %104, %91, %cst_29 {dimension_numbers = #tpu.dot_dimension_numbers<[2], [1], [1], [2], [0, 0, 0, 1, 1, 2], [0], [0]>} : vector<1x8x8xf32>, vector<1x8x8xf32>, vector<1x8x8xf32> -> vector<1x8x8xf32>
    "tpu.trace_stop"() : () -> ()
    %106 = tpu.concatenate %45, %65, %85, %105 in 2 : vector<1x8x8xf32>, vector<1x8x8xf32>, vector<1x8x8xf32>, vector<1x8x8xf32> -> vector<1x8x32xf32>
    %107 = vector.shape_cast %106 : vector<1x8x32xf32> to vector<8x32xf32>
    %c0_30 = arith.constant 0 : index
    %c0_31 = arith.constant 0 : index
    %108 = vector.load %arg4[%c0_30, %c0_31] : memref<32x32xf32, #tpu.memory_space<vmem>>, vector<32x32xf32>
    %cst_32 = arith.constant dense<0.000000e+00> : vector<8x32xf32>
    %109 = tpu.matmul %107, %108, %cst_32 {dimension_numbers = #tpu.dot_dimension_numbers<[1], [0], [0], [1], [0, 0, 1, 1], [], []>} : vector<8x32xf32>, vector<32x32xf32>, vector<8x32xf32> -> vector<8x32xf32>
    %c0_33 = arith.constant 0 : index
    %c0_34 = arith.constant 0 : index
    %110 = vector.load %arg5[%c0_33, %c0_34] : memref<1x32xf32, #tpu.memory_space<vmem>>, vector<1x32xf32>
    %111 = vector.broadcast %110 : vector<1x32xf32> to vector<8x32xf32>
    %112 = arith.addf %109, %111 : vector<8x32xf32>
    %113 = arith.addf %0, %112 : vector<8x32xf32>
    %cst_35 = arith.constant dense<0.000000e+00> : vector<8xf32>
    %114 = vector.multi_reduction <add>, %113, %cst_35 [1] : vector<8x32xf32> to vector<8xf32>
    %115 = vector.shape_cast %114 : vector<8xf32> to vector<8x1xf32>
    %cst_36 = arith.constant 3.200000e+01 : f32
    %116 = vector.broadcast %cst_36 : f32 to vector<8x1xf32>
    %117 = arith.divf %115, %116 : vector<8x1xf32>
    %118 = vector.broadcast %117 : vector<8x1xf32> to vector<8x32xf32>
    %119 = arith.subf %113, %118 : vector<8x32xf32>
    %120 = arith.mulf %119, %119 : vector<8x32xf32>
    %cst_37 = arith.constant dense<0.000000e+00> : vector<8xf32>
    %121 = vector.multi_reduction <add>, %120, %cst_37 [1] : vector<8x32xf32> to vector<8xf32>
    %122 = vector.shape_cast %121 : vector<8xf32> to vector<8x1xf32>
    %cst_38 = arith.constant 3.200000e+01 : f32
    %123 = vector.broadcast %cst_38 : f32 to vector<8x1xf32>
    %124 = arith.divf %122, %123 : vector<8x1xf32>
    %cst_39 = arith.constant 9.99999974E-6 : f32
    %125 = vector.broadcast %cst_39 : f32 to vector<8x1xf32>
    %126 = arith.addf %124, %125 : vector<8x1xf32>
    %127 = math.rsqrt %126 : vector<8x1xf32>
    %128 = vector.broadcast %127 : vector<8x1xf32> to vector<8x32xf32>
    %129 = arith.mulf %119, %128 : vector<8x32xf32>
    %c0_40 = arith.constant 0 : index
    %c0_41 = arith.constant 0 : index
    %130 = vector.load %arg6[%c0_40, %c0_41] : memref<32x128xf32, #tpu.memory_space<vmem>>, vector<32x128xf32>
    %cst_42 = arith.constant dense<0.000000e+00> : vector<8x128xf32>
    %131 = tpu.matmul %129, %130, %cst_42 {dimension_numbers = #tpu.dot_dimension_numbers<[1], [0], [0], [1], [0, 0, 1, 1], [], []>} : vector<8x32xf32>, vector<32x128xf32>, vector<8x128xf32> -> vector<8x128xf32>
    %c0_43 = arith.constant 0 : index
    %c0_44 = arith.constant 0 : index
    %132 = vector.load %arg7[%c0_43, %c0_44] : memref<1x128xf32, #tpu.memory_space<vmem>>, vector<1x128xf32>
    %133 = vector.broadcast %132 : vector<1x128xf32> to vector<8x128xf32>
    %134 = arith.addf %131, %133 : vector<8x128xf32>
    %cst_45 = arith.constant 0.000000e+00 : f32
    %135 = vector.broadcast %cst_45 : f32 to vector<8x128xf32>
    %136 = arith.maximumf %134, %135 : vector<8x128xf32>
    %c0_46 = arith.constant 0 : index
    %c0_47 = arith.constant 0 : index
    %137 = vector.load %arg8[%c0_46, %c0_47] : memref<128x32xf32, #tpu.memory_space<vmem>>, vector<128x32xf32>
    %cst_48 = arith.constant dense<0.000000e+00> : vector<8x32xf32>
    %138 = tpu.matmul %136, %137, %cst_48 {dimension_numbers = #tpu.dot_dimension_numbers<[1], [0], [0], [1], [0, 0, 1, 1], [], []>} : vector<8x128xf32>, vector<128x32xf32>, vector<8x32xf32> -> vector<8x32xf32>
    %c0_49 = arith.constant 0 : index
    %c0_50 = arith.constant 0 : index
    %139 = vector.load %arg9[%c0_49, %c0_50] : memref<1x32xf32, #tpu.memory_space<vmem>>, vector<1x32xf32>
    %140 = vector.broadcast %139 : vector<1x32xf32> to vector<8x32xf32>
    %141 = arith.addf %138, %140 : vector<8x32xf32>
    %142 = arith.addf %113, %141 : vector<8x32xf32>
    %c0_51 = arith.constant 0 : index
    %c0_52 = arith.constant 0 : index
    %143 = vector.load %arg10[%c0_51, %c0_52] : memref<8x32xf32, #tpu.memory_space<vmem>>, vector<8x32xf32>
    tpu.vector_store %arg10[%c0_51, %c0_52], %142 {strides = array<i32>} : memref<8x32xf32, #tpu.memory_space<vmem>>, vector<8x32xf32>,
    return
  }
  func.func @transform_0(%arg0: i32) -> (i32, i32) {
    %c0_i32 = arith.constant 0 : i32
    %c0_i32_0 = arith.constant 0 : i32
    return %arg0, %c0_i32 : i32, i32
  }
  func.func @transform_1(%arg0: i32) -> (i32, i32) {
    %c0_i32 = arith.constant 0 : i32
    %c0_i32_0 = arith.constant 0 : i32
    %c0_i32_1 = arith.constant 0 : i32
    return %c0_i32, %c0_i32_0 : i32, i32
  }
  func.func @transform_2(%arg0: i32) -> (i32, i32) {
    %c0_i32 = arith.constant 0 : i32
    %c0_i32_0 = arith.constant 0 : i32
    %c0_i32_1 = arith.constant 0 : i32
    return %c0_i32, %c0_i32_0 : i32, i32
  }
  func.func @transform_3(%arg0: i32) -> (i32, i32) {
    %c0_i32 = arith.constant 0 : i32
    %c0_i32_0 = arith.constant 0 : i32
    %c0_i32_1 = arith.constant 0 : i32
    return %c0_i32, %c0_i32_0 : i32, i32
  }
  func.func @transform_4(%arg0: i32) -> (i32, i32) {
    %c0_i32 = arith.constant 0 : i32
    %c0_i32_0 = arith.constant 0 : i32
    %c0_i32_1 = arith.constant 0 : i32
    return %c0_i32, %c0_i32_0 : i32, i32
  }
  func.func @transform_5(%arg0: i32) -> (i32, i32) {
    %c0_i32 = arith.constant 0 : i32
    %c0_i32_0 = arith.constant 0 : i32
    %c0_i32_1 = arith.constant 0 : i32
    return %c0_i32, %c0_i32_0 : i32, i32
  }
  func.func @transform_6(%arg0: i32) -> (i32, i32) {
    %c0_i32 = arith.constant 0 : i32
    %c0_i32_0 = arith.constant 0 : i32
    %c0_i32_1 = arith.constant 0 : i32
    return %c0_i32, %c0_i32_0 : i32, i32
  }
  func.func @transform_7(%arg0: i32) -> (i32, i32) {
    %c0_i32 = arith.constant 0 : i32
    %c0_i32_0 = arith.constant 0 : i32
    %c0_i32_1 = arith.constant 0 : i32
    return %c0_i32, %c0_i32_0 : i32, i32
  }
  func.func @transform_8(%arg0: i32) -> (i32, i32) {
    %c0_i32 = arith.constant 0 : i32
    %c0_i32_0 = arith.constant 0 : i32
    %c0_i32_1 = arith.constant 0 : i32
    return %c0_i32, %c0_i32_0 : i32, i32
  }
  func.func @transform_9(%arg0: i32) -> (i32, i32) {
    %c0_i32 = arith.constant 0 : i32
    %c0_i32_0 = arith.constant 0 : i32
    return %arg0, %c0_i32 : i32, i32
  }
}

</mosaic_0001>

<bundles_post_ra>
// kernel: tpu_custom_call.1
= control target key start
LH: loop header
LB: loop body
LE: loop exit
PB: predicated region body
PF: predicated region fallthrough
CT: control target
= control target key end

     0   :  { %14 = vsyncpa [#allocation3], 0  ;;  %s2199_s0 = inlined_call_operand.vmem [shape: f32[16,32], index: 0, kind: input, shape index: {}]   ;;  %s2200_s1 = inlined_call_operand.vmem [shape: f32[32,96], index: 1, kind: input, shape index: {}]   ;;  %s2201_s2 = inlined_call_operand.vmem [shape: f32[1,96], index: 2, kind: input, shape index: {}]   ;;  %s2202_s3 = inlined_call_operand.vmem [shape: f32[32,32], index: 3, kind: input, shape index: {}]   ;;  %s2203_s4 = inlined_call_operand.vmem [shape: f32[1,32], index: 4, kind: input, shape index: {}]   ;;  %s2204_s5 = inlined_call_operand.vmem [shape: f32[32,128], index: 5, kind: input, shape index: {}]   ;;  %s2205_s6 = inlined_call_operand.vmem [shape: f32[1,128], index: 6, kind: input, shape index: {}]   ;;  %s2206_s7 = inlined_call_operand.vmem [shape: f32[128,32], index: 7, kind: input, shape index: {}]   ;;  %s2207_s8 = inlined_call_operand.vmem [shape: f32[1,32], index: 8, kind: input, shape index: {}]   ;;  %s2208_s9 = inlined_call_operand.hbm [shape: f32[16,32], index: 9, kind: output, shape index: {}]  }
   0x1   :  { %16 = vsyncpa [#allocation3 + $0x1], 0  ;;  %s1900_s30 = smov 0   ;;  %s1902_s10 = smov 0  }
   0x2   :  { %s1904_s11 = smov 0   ;;  %s1906_s12 = smov 0  }
   0x3 LB: > { %s1921_s13 = sadd.s32 4294967295, %s1830_s12   ;;  %s1465_s14 = sadd.s32 4294967294, %s1830_s12   ;;  %s1830_s12 = sphi %s1906_s12, %s2214_s12   ;;  %s1826_s11 = sphi %s1904_s11, %s2213_s11   ;;  %s1822_s10 = sphi %s1902_s10, %s2212_s10   ;;  %s1818_s30 = sphi %s1900_s30, %s2211_s30  }
   0x4   : > { %s1925_s15 = sadd.s32 1, %s1830_s12   ;;  %s223_s16 = sadd.s32 1, %s1826_s11 }
   0x5   : > { %s220_s17 = ssub.s32 %s1830_s12, %s1925_s15  ;;  %p233_p0 = scmp.ne.s32.totalorder %s1826_s11, %s1822_s10 }
   0x6   : > { %p221_p1 = scmp.eq.s32.totalorder %s220_s17, 0  ;;  %p234_p2 = scmp.eq.s32.totalorder %s1921_s13, 1 }
   0x7   : > { %p239_p3 = scmp.ne.s32.totalorder %s1822_s10, %s1818_s30  ;;  %p240_p4 = scmp.eq.s32.totalorder %s1465_s14, 1 }
   0x8   : > { %s1936_s18 = scalar_select %p221_p1, %s1826_s11, %s223_s16  }
   0x9   : > { %p1938_p5 = por %p234_p2, %p233_p0  ;;  %p1942_p6 = por %p240_p4, %p239_p3 }
   0xa   : > { %p1468_p7 = scmp.ge.s32.totalorder %s1830_s12, 1  ;;  %p289_p8 = scmp.lt.s32.totalorder %s1830_s12, 3 }
   0xc   : > { %p290_p9 = pnand %p1468_p7, %p289_p8 }
   0xd   : > { %p324_p10 = scmp.lt.s32.totalorder (!%p290_p9), %s1921_s13, 1  ;;  %vm329_vm0 = vcmask (!%p290_p9), 261120   ;;  %v344_v7 = vld [vmem:[%s2200_s1] sm:$0xff] (!%p290_p9)  ;;  %v345_v8 = vld [vmem:[%s2200_s1 + $0x8] sm:$0xff] (!%p290_p9)  ;;  %v346_v9 = vld [vmem:[%s2200_s1 + $0x10] sm:$0xff] (!%p290_p9)  ;;  %v1832_v10 = vmov (!%p290_p9), 0.0|0.0   ;;  %v428_v31 = vlaneseq (!%p290_p9) }
   0xe   : > { %293 = sbr.rel (%p290_p9) target bundleno = 2510 (0x9ce), region = 56  ;;  %1650 = vmatprep.subr.bf16.mxu1 (!%p290_p9), %v1832_v10  ;;  %v1651_v11 = vpack.c.bf16 (!%p290_p9), %v345_v8, %v344_v7  ;;  %v347_v12 = vld [vmem:[%s2200_s1 + $0x18] sm:$0xff] (!%p290_p9)  ;;  %vm1833_vm1 = vmmov (!%p290_p9), 0   ;;  %v1834_v13 = vmov (!%p290_p9), 0.0   ;;  %v1471_v20 = vld [vmem:[%s2201_s2] ss:$0 sm:$0xff] (!%p290_p9) }
   0xf   : > { %1550 = vmatprep.mubr.msk.f32.mxu1 (!%p290_p9), %vm1833_vm1, %v1834_v13  ;;  %1563 = vmatprep.subr.mxu0 (!%p290_p9), %v1834_v13  ;;  %v1654_v14 = vpack.c.bf16 (!%p290_p9), %v347_v12, %v346_v9  ;;  %s1835_s24 = smov (!%p290_p9), 120   ;;  %s1837_s26 = smov (!%p290_p9), 88   ;;  %vm436_vm2 = vcmask (!%p290_p9), 64512   ;;  %v429_v32 = vshrl.u32 (!%p290_p9), %v428_v31, 7  ;;  %v431_v33 = vand.u32 (!%p290_p9), 127, %v428_v31  ;;  %v1117_v31 = vld [vmem:[%s2202_s3 + $0x18] sm:$0xff] (!%p290_p9) }
  0x10   : > { %1565 = vmatprep.mubr.msk.f32.mxu0 (!%p290_p9), %vm1833_vm1, %v1834_v13  ;;  %1652 = vmatpush3.bf16.msra.mxu1 (!%p290_p9), %v1651_v11  ;;  %s1838_s27 = smov (!%p290_p9), 80   ;;  %s1839_s28 = smov (!%p290_p9), 112   ;;  %vm1110_vm4 = vcmask (!%p290_p9), 130048   ;;  %vm1112_vm5 = vcmask (!%p290_p9), 195584  }
  0x11   : > { %1653 = vmatprep.subr.bf16.mxu1 (!%p290_p9), %v1832_v10  ;;  %s1840_s29 = smov (!%p290_p9), 72   ;;  %s1841_s14 = smov (!%p290_p9), 104   ;;  %vm432_vm3 = vcmp.le.s32.totalorder (!%p290_p9), %v431_v33, %v429_v32 }
  0x12   : > { %s1842_s16 = smov (!%p290_p9), 64   ;;  %s1843_s17 = smov (!%p290_p9), 48  }
  0x14   : > { %1655 = vmatpush3.bf16.msra.mxu1 (!%p290_p9), %v1654_v14 }
  0x15   : > { %s325_s21 = scalar_select %p324_p10, %s1921_s13, 1  ;;  %1553 = vmatprep.subr.mxu1 %v1834_v13 }
  0x17   : > { %s1470_s22 = sshll.u32 %s325_s21, 3  ;;  %s1844_s21 = smov 40  }
  0x18   : > { %s327_s25 = scalar_lea.vmem %s2199_s0, %s1470_s22  ;;  %s1845_s22 = smov 56  }
  0x19   : > { %v1953_v0 = vld [vmem:[%s327_s25] sm:$0xff]  ;;  %s1836_s25 = smov 96  }
  0x1a   : > { %v330_v1 = vsel %vm329_vm0, %v1953_v0, 0.0 }
  0x1b   : > { %331 = vadd.xlane.f32.xlu0 %v330_v1 }
  0xa8   : > { %v332_v2 = vpop.xlane.xlu0 %331 }
  0xa9   : > { %v334_v3 = vmul.f32 0.03125, %v332_v2 }
  0xab   : > { %v335_v4 = vsub.f32 %v1953_v0, %v334_v3 }
  0xad   : > { %v336_v5 = vmul.f32 %v335_v4, %v335_v4 }
  0xaf   : > { %v337_v6 = vsel %vm329_vm0, %v336_v5, 0.0 }
  0xb0   : > { %338 = vadd.xlane.f32.xlu0 %v337_v6 }
 0x13d   : > { %v339_v15 = vpop.xlane.xlu0 %338 }
 0x13e   : > { %v340_v16 = vmul.f32 0.03125, %v339_v15 }
 0x140   : > { %v341_v17 = vadd.f32 1e-05, %v340_v16 }
 0x142   : > { %1748 = vrsqrt.f32 %v341_v17 }
 0x14c   : > { %v1749_v18 = vpop.eup %1748 }
 0x14d   : > { %v343_v19 = vmul.f32 %v1749_v18, %v335_v4 }
 0x14f   : > { %1551 = vmatmul.mubr.msk.f32.vlgmr.msra.gmra.mrb[0].mxu1 %vm329_vm0, %v343_v19 }
 0x150   : > { %1555 = vmatprep.mubr.msk.f32.mxu1 %vm1833_vm1, %v1834_v13 }
 0x222   : > { %v424_v21 = vpop.f32.mrb[0].mxu1 }
 0x223   : > { %v1985_v22 = vadd.f32 %v1471_v20, %v424_v21  ;;  %v1552_v23 = vpop.f32.mrb[1].mxu1 }
 0x225   : > { %599 = vrot.lane.b32.xlu0 %v1985_v22, %s1835_s24  ;;  %434 = vrot.lane.b32.xlu1 %v1985_v22, %s1836_s25 }
 0x229   : > { %601 = vrot.lane.b32.xlu1 %v1985_v22, %s1837_s26 }
 0x22d   : > { %767 = vrot.lane.b32.xlu1 %v1985_v22, %s1838_s27 }
 0x231   : > { %765 = vrot.lane.b32.xlu1 %v1985_v22, %s1839_s28 }
 0x235   : > { %933 = vrot.lane.b32.xlu1 %v1985_v22, %s1840_s29  ;;  %s1849_s29 = smov [#allocation2]  }
 0x239   : > { %931 = vrot.lane.b32.xlu1 %v1985_v22, %s1841_s14  ;;  %s321_s14 = sand.u32 1, %s1822_s10  }
 0x23a   : > { %s1393_s28 = scalar_lea.sflag [#allocation3], %s321_s14 }
 0x297   : > { %v435_v24 = vpop.permute.xlu1 %434  ;;  %v600_v26 = vpop.permute.xlu0 %599 }
 0x298   : > { %1554 = vmatpush3.xpose.msk.msra.mxu1 %vm436_vm2, %v435_v24 }
 0x299   : > { %1558 = vmatprep.subr.mxu1 %v1834_v13 }
 0x29b   : > { %1556 = vmatmul.mubr.msk.f32.vlgmr.msra.gmra.mrb[2].mxu1 %vm436_vm2, %v1985_v22  ;;  %v602_v25 = vpop.permute.xlu1 %601 }
 0x29c   : > { %1564 = vmatpush3.xpose.msk.msra.mxu0 %vm436_vm2, %v602_v25  ;;  %1560 = vmatprep.mubr.msk.f32.mxu1 %vm1833_vm1, %v1834_v13  ;;  %v1114_v25 = vld [vmem:[%s2202_s3] sm:$0xff] }
 0x29d   : > { %1573 = vmatprep.subr.mxu0 %v1834_v13 }
 0x29f   : > { %1566 = vmatmul.mubr.msk.f32.vlgmr.msra.gmra.mrb[0].mxu0 %vm436_vm2, %v600_v26  ;;  %v768_v27 = vpop.permute.xlu1 %767  ;;  %v1115_v26 = vld [vmem:[%s2202_s3 + $0x8] sm:$0xff] }
 0x2a0   : > { %1574 = vmatpush3.xpose.msk.msra.mxu0 %vm436_vm2, %v768_v27  ;;  %1575 = vmatprep.mubr.msk.f32.mxu0 %vm1833_vm1, %v1834_v13  ;;  %v1657_v27 = vpack.c.bf16 %v1115_v26, %v1114_v25  ;;  %v1311_v25 = vld [vmem:[%s2206_s7 + $0x70] sm:$0xff]  ;;  %v1312_v26 = vld [vmem:[%s2206_s7 + $0x78] sm:$0xff] }
 0x2a1   : > { %1583 = vmatprep.subr.mxu0 %v1834_v13 }
 0x2a3   : > { %v766_v28 = vpop.permute.xlu1 %765 }
 0x2a4   : > { %1576 = vmatmul.mubr.msk.f32.vlgmr.msra.gmra.mrb[2].mxu0 %vm436_vm2, %v766_v28 }
 0x2a5   : > { %1585 = vmatprep.mubr.msk.f32.mxu0 %vm1833_vm1, %v1834_v13 }
 0x2a7   : > { %v934_v29 = vpop.permute.xlu1 %933 }
 0x2a8   : > { %1584 = vmatpush3.xpose.msk.msra.mxu0 %vm436_vm2, %v934_v29 }
 0x2a9   : > { %1668 = vmatprep.subr.bf16.mxu0 %v1832_v10 }
 0x2ab   : > { %v932_v30 = vpop.permute.xlu1 %931 }
 0x2ac   : > { %1586 = vmatmul.mubr.msk.f32.vlgmr.msra.gmra.mrb[4].mxu0 %vm436_vm2, %v932_v30  ;;  %v1116_v30 = vld [vmem:[%s2202_s3 + $0x10] sm:$0xff] }
 0x2ad   : > { %1647 = vmatprep.mubr.msk.f32.mxu0 %vm1833_vm1, %v1834_v13  ;;  %v1660_v32 = vpack.c.bf16 %v1117_v31, %v1116_v30 }
 0x36e   : > { %v507_v34 = vpop.f32.mrb[2].mxu1 }
 0x36f   : > { %v511_v35 = vsel %vm432_vm3, %v507_v34, -1e+30  ;;  %v1557_v36 = vpop.f32.mrb[3].mxu1 }
 0x370   : > { %v512_v37 = vsel %vm436_vm2, %v511_v35, -inf }
 0x371   : > { %513 = vmax.xlane.f32.xlu1 %v512_v37 }
 0x372   : > { %v673_v38 = vpop.f32.mrb[0].mxu0 }
 0x373   : > { %v677_v39 = vsel %vm432_vm3, %v673_v38, -1e+30  ;;  %v1567_v40 = vpop.f32.mrb[1].mxu0 }
 0x374   : > { %v678_v41 = vsel %vm436_vm2, %v677_v39, -inf }
 0x375   : > { %679 = vmax.xlane.f32.xlu0 %v678_v41 }
 0x377   : > { %v839_v42 = vpop.f32.mrb[2].mxu0 }
 0x378   : > { %v843_v43 = vsel %vm432_vm3, %v839_v42, -1e+30  ;;  %v1577_v44 = vpop.f32.mrb[3].mxu0 }
 0x379   : > { %v844_v45 = vsel %vm436_vm2, %v843_v43, -inf }
 0x37a   : > { %845 = vmax.xlane.f32.xlu1 %v844_v45  ;;  %v1485_v45 = vld [vmem:[%s2203_s4] ss:$0 sm:$0xff] }
 0x37f   : > { %v1005_v46 = vpop.f32.mrb[4].mxu0 }
 0x380   : > { %v1009_v47 = vsel %vm432_vm3, %v1005_v46, -1e+30  ;;  %v1587_v48 = vpop.f32.mrb[5].mxu0 }
 0x381   : > { %v1010_v49 = vsel %vm436_vm2, %v1009_v47, -inf }
 0x382   : > { %1011 = vmax.xlane.f32.xlu0 %v1010_v49 }
 0x38b   : > { %523 = vrot.lane.b32.xlu1 %v1985_v22, %s1842_s16  ;;  %s1846_s16 = smov 8  }
 0x3fe   : > { %v514_v50 = vpop.xlane.xlu1 %513 }
 0x3ff   : > { %v515_v51 = vsub.f32 %v511_v35, %v514_v50 }
 0x401   : > { %v516_v52 = vmul.f32 1.442695, %v515_v51 }
 0x402   : > { %v680_v53 = vpop.xlane.xlu0 %679 }
 0x403   : > { %1750 = vpow2.f32 %v516_v52  ;;  %v681_v54 = vsub.f32 %v677_v39, %v680_v53 }
 0x405   : > { %v682_v55 = vmul.f32 1.442695, %v681_v54 }
 0x407   : > { %1752 = vpow2.f32 %v682_v55  ;;  %v846_v56 = vpop.xlane.xlu1 %845  ;;  %v1212_v55 = vld [vmem:[%s2204_s5] sm:$0xff] }
 0x408   : > { %v847_v57 = vsub.f32 %v843_v43, %v846_v56 }
 0x40a   : > { %v848_v58 = vmul.f32 1.442695, %v847_v57  ;;  %v1214_v57 = vld [vmem:[%s2204_s5 + $0x10] sm:$0xff] }
 0x40b   : > { %v524_v59 = vpop.permute.xlu1 %523 }
 0x40c   : > { %1754 = vpow2.f32 %v848_v58  ;;  %1559 = vmatpush3.msra.mxu1 %v524_v59  ;;  %v1215_v58 = vld [vmem:[%s2204_s5 + $0x18] sm:$0xff] }
 0x40d   : > { %v1751_v60 = vpop.eup %1750  ;;  %1568 = vmatprep.subr.mxu1 %v1834_v13  ;;  %v1666_v59 = vpack.c.bf16 %v1215_v58, %v1214_v57 }
 0x40e   : > { %v518_v61 = vsel %vm436_vm2, %v1751_v60, 0.0 }
 0x40f   : > { %v1012_v62 = vpop.xlane.xlu0 %1011  ;;  %519 = vadd.xlane.f32.xlu1 %v518_v61  ;;  %v1298_v61 = vld [vmem:[%s2206_s7 + $0x8] sm:$0xff] }
 0x410   : > { %v1013_v63 = vsub.f32 %v1009_v47, %v1012_v62  ;;  %v1299_v62 = vld [vmem:[%s2206_s7 + $0x10] sm:$0xff] }
 0x411   : > { %v1753_v1 = vpop.eup %1752 }
 0x412   : > { %v1014_v2 = vmul.f32 1.442695, %v1013_v63  ;;  %v684_v3 = vsel %vm436_vm2, %v1753_v1, 0.0 }
 0x413   : > { %685 = vadd.xlane.f32.xlu0 %v684_v3  ;;  %v1301_v3 = vld [vmem:[%s2206_s7 + $0x20] sm:$0xff] }
 0x414   : > { %1756 = vpow2.f32 %v1014_v2 }
 0x416   : > { %v1755_v4 = vpop.eup %1754 }
 0x417   : > { %v850_v5 = vsel %vm436_vm2, %v1755_v4, 0.0 }
 0x418   : > { %851 = vadd.xlane.f32.xlu1 %v850_v5 }
 0x41e   : > { %v1757_v6 = vpop.eup %1756 }
 0x41f   : > { %v1016_v7 = vsel %vm436_vm2, %v1757_v6, 0.0 }
 0x420   : > { %1017 = vadd.xlane.f32.xlu0 %v1016_v7  ;;  %v1304_v7 = vld [vmem:[%s2206_s7 + $0x38] sm:$0xff] }
 0x429   : > { %855 = vrot.lane.b32.xlu1 %v1985_v22, %s1843_s17  ;;  %s1847_s17 = smov 16  }
 0x42d   : > { %1021 = vrot.lane.b32.xlu1 %v1985_v22, %s1844_s21  ;;  %s1848_s21 = smov 24  }
 0x436   : > { %689 = vrot.lane.b32.xlu0 %v1985_v22, %s1845_s22  ;;  %s1491_s22 = sshll.u32 %s1921_s13, 7 }
 0x437   : > { %s2156_s27 = scalar_lea.hbm %s2208_s9, %s1491_s22 }
 0x49c   : > { %v520_v8 = vpop.xlane.xlu1 %519 }
 0x49d   : > { %1758 = vrcp.f32 %v520_v8 }
 0x4a0   : > { %v686_v9 = vpop.xlane.xlu0 %685 }
 0x4a1   : > { %1760 = vrcp.f32 %v686_v9  ;;  %v1305_v9 = vld [vmem:[%s2206_s7 + $0x40] sm:$0xff] }
 0x4a5   : > { %v852_v11 = vpop.xlane.xlu1 %851 }
 0x4a6   : > { %1762 = vrcp.f32 %v852_v11  ;;  %v1306_v11 = vld [vmem:[%s2206_s7 + $0x48] sm:$0xff] }
 0x4a7   : > { %v1759_v12 = vpop.eup %1758 }
 0x4a8   : > { %v522_v14 = vmul.f32 %v1759_v12, %v1751_v60  ;;  %v1297_v60 = vld [vmem:[%s2206_s7] sm:$0xff]  ;;  %v1681_v12 = vpack.c.bf16 %v1306_v11, %v1305_v9 }
 0x4a9   : > { %v856_v18 = vpop.permute.xlu1 %855  ;;  %v1669_v63 = vpack.c.bf16 %v1298_v61, %v1297_v60 }
 0x4aa   : > { %1561 = vmatmul.mubr.msk.f32.vlgmr.msra.gmra.mrb[4].mxu1 %vm436_vm2, %v522_v14  ;;  %v1307_v14 = vld [vmem:[%s2206_s7 + $0x50] sm:$0xff] }
 0x4ab   : > { %1570 = vmatprep.mubr.msk.f32.mxu1 %vm1833_vm1, %v1834_v13  ;;  %v1761_v16 = vpop.eup %1760  ;;  %1670 = vmatpush3.bf16.msra.mxu0 %v1669_v63 }
 0x4ac   : > { %v688_v17 = vmul.f32 %v1761_v16, %v1753_v1  ;;  %v1300_v1 = vld [vmem:[%s2206_s7 + $0x18] sm:$0xff]  ;;  %1671 = vmatprep.subr.bf16.mxu0 %v1832_v10 }
 0x4ad   : > { %v1018_v15 = vpop.xlane.xlu0 %1017  ;;  %v1022_v22 = vpop.permute.xlu1 %1021  ;;  %v1672_v2 = vpack.c.bf16 %v1300_v1, %v1299_v62 }
 0x4ae   : > { %1764 = vrcp.f32 %v1018_v15  ;;  %v1308_v15 = vld [vmem:[%s2206_s7 + $0x58] sm:$0xff] }
 0x4af   : > { %1673 = vmatpush3.bf16.msra.mxu0 %v1672_v2  ;;  %v1684_v16 = vpack.c.bf16 %v1308_v15, %v1307_v14 }
 0x4b0   : > { %v1763_v20 = vpop.eup %1762  ;;  %1674 = vmatprep.subr.bf16.mxu0 %v1832_v10 }
 0x4b1   : > { %v690_v19 = vpop.permute.xlu0 %689  ;;  %v854_v21 = vmul.f32 %v1763_v20, %v1755_v4  ;;  %v1302_v4 = vld [vmem:[%s2206_s7 + $0x28] sm:$0xff] }
 0x4b2   : > { %1569 = vmatpush3.msra.mxu1 %v690_v19  ;;  %v1675_v5 = vpack.c.bf16 %v1302_v4, %v1301_v3 }
 0x4b3   : > { %1571 = vmatmul.mubr.msk.f32.vlgmr.msra.gmra.mrb[6].mxu1 %vm436_vm2, %v688_v17  ;;  %1578 = vmatprep.subr.mxu1 %v1834_v13  ;;  %v1309_v17 = vld [vmem:[%s2206_s7 + $0x60] sm:$0xff] }
 0x4b4   : > { %1579 = vmatpush3.msra.mxu1 %v856_v18  ;;  %1580 = vmatprep.mubr.msk.f32.mxu1 %vm1833_vm1, %v1834_v13  ;;  %v1310_v18 = vld [vmem:[%s2206_s7 + $0x68] sm:$0xff] }
 0x4b5   : > { %1588 = vmatprep.subr.mxu1 %v1834_v13  ;;  %1676 = vmatpush3.bf16.msra.mxu0 %v1675_v5  ;;  %v1687_v19 = vpack.c.bf16 %v1310_v18, %v1309_v17 }
 0x4b6   : > { %1677 = vmatprep.subr.bf16.mxu0 %v1832_v10 }
 0x4b7   : > { %1581 = vmatmul.mubr.msk.f32.vlgmr.msra.gmra.mrb[8].mxu1 %vm436_vm2, %v854_v21 }
 0x4b8   : > { %v1765_v23 = vpop.eup %1764  ;;  %1589 = vmatpush3.msra.mxu1 %v1022_v22  ;;  %1590 = vmatprep.mubr.msk.f32.mxu1 %vm1833_vm1, %v1834_v13 }
 0x4b9   : > { %v1020_v24 = vmul.f32 %v1765_v23, %v1757_v6  ;;  %1656 = vmatprep.subr.bf16.mxu1 %v1832_v10  ;;  %v1303_v6 = vld [vmem:[%s2206_s7 + $0x30] sm:$0xff] }
 0x4ba   : > { %v1678_v8 = vpack.c.bf16 %v1304_v7, %v1303_v6 }
 0x4bb   : > { %1591 = vmatmul.mubr.msk.f32.vlgmr.msra.gmra.mrb[10].mxu1 %vm436_vm2, %v1020_v24 }
 0x4bc   : > { %1601 = vmatprep.mubr.msk.f32.mxu1 %vm1833_vm1, %v1834_v13  ;;  %1658 = vmatpush3.bf16.msra.mxu1 %v1657_v27  ;;  %v1690_v27 = vpack.c.bf16 %v1312_v26, %v1311_v25 }
 0x4bd   : > { %1659 = vmatprep.subr.bf16.mxu1 %v1832_v10  ;;  %1679 = vmatpush3.bf16.msra.mxu0 %v1678_v8 }
 0x4be   : > { %1680 = vmatprep.subr.bf16.mxu0 %v1832_v10 }
 0x4c0   : > { %1661 = vmatpush3.bf16.msra.mxu1 %v1660_v32  ;;  %v1489_v32 = vld [vmem:[%s2207_s8] ss:$0 sm:$0xff] }
 0x4c1   : > { %1662 = vmatprep.subr.bf16.mxu1 %v1832_v10  ;;  %1682 = vmatpush3.bf16.msra.mxu0 %v1681_v12 }
 0x4c2   : > { %1683 = vmatprep.subr.bf16.mxu0 %v1832_v10 }
 0x4c5   : > { %1685 = vmatpush3.bf16.msra.mxu0 %v1684_v16 }
 0x4c6   : > { %1686 = vmatprep.subr.bf16.mxu0 %v1832_v10 }
 0x4c9   : > { %1688 = vmatpush3.bf16.msra.mxu0 %v1687_v19 }
 0x4ca   : > { %1689 = vmatprep.subr.bf16.mxu0 %v1832_v10 }
 0x4cd   : > { %1691 = vmatpush3.bf16.msra.mxu0 %v1690_v27 }
 0x57d   : > { %v595_v28 = vpop.f32.mrb[4].mxu1 }
 0x57e   : > { %v1562_v29 = vpop.f32.mrb[5].mxu1 }
 0x586   : > { %v761_v33 = vpop.f32.mrb[6].mxu1 }
 0x587   : > { %1098 = vrot.lane.b32.xlu0 %v761_v33, %s1846_s16  ;;  %v1572_v34 = vpop.f32.mrb[7].mxu1  ;;  %s1469_s16 = sshll.u32 %s321_s14, 3 }
 0x588   : > { %s323_s23 = scalar_lea.vmem [#allocation2], %s1469_s16  ;;  %s1772_s16 = sshll.u32 %s1849_s29, 4  ;;  %s1773_s16 = int_to_ptr.vmem [resolvable:$false] %s1772_s16 }
 0x589   : > { %s1406_s24 = sshll.u32 %s323_s23, 4  ;;  %s2158_s24 = int_to_ptr.vmem [resolvable:$true] %s1406_s24 }
 0x58a   : > { %v927_v35 = vpop.f32.mrb[8].mxu1  ;;  %s1768_s13 = scalar_lea.vmem %s2158_s24, 128  ;;  %p1775_p0 = scmp.lt.s32.totalorder %s2158_s24, %s1773_s16 }
 0x58b   : > { %1102 = vrot.lane.b32.xlu1 %v927_v35, %s1847_s17  ;;  %v1582_v36 = vpop.f32.mrb[9].mxu1  ;;  %p1769_p11 = scmp.ne.s32.totalorder %s2158_s24, %s1768_s13  ;;  %s1774_s17 = scalar_lea.vmem %s1773_s16, 256 }
 0x58c   : > { %p1776_p1 = scmp.lt.s32.totalorder %s1774_s17, %s1768_s13 }
 0x58d   : > { %p1770_p12 = pnand %p1769_p11, %p1938_p5 }
 0x58e   : > { %v1093_v37 = vpop.f32.mrb[10].mxu1  ;;  %p1777_p2 = por %p1776_p1, %p1775_p0 }
 0x58f   : > { %1106 = vrot.lane.b32.xlu0 %v1093_v37, %s1848_s21  ;;  %v1592_v38 = vpop.f32.mrb[11].mxu1  ;;  %p1771_p13 = pneg %p1770_p12 }
 0x591   : > { %p1778_p3 = pnand %p1777_p2, %p1771_p13 }
 0x5f9   : > { %v1099_v39 = vpop.permute.xlu0 %1098 }
 0x5fa   : > { %v1109_v41 = vsel %vm436_vm2, %v595_v28, %v1099_v39 }
 0x5fd   : > { %v1103_v40 = vpop.permute.xlu1 %1102 }
 0x5fe   : > { %v1111_v42 = vsel %vm1110_vm4, %v1109_v41, %v1103_v40 }
 0x601   : > { %v1107_v43 = vpop.permute.xlu0 %1106 }
 0x602   : > { %v1113_v44 = vsel %vm1112_vm5, %v1111_v42, %v1107_v43 }
 0x603   : > { %1602 = vmatmul.mubr.msk.f32.vlgmr.msra.gmra.mrb[12].mxu1 %vm329_vm0, %v1113_v44 }
 0x604   : > { %1612 = vmatprep.mubr.msk.f32.mxu1 %vm1833_vm1, %v1834_v13 }
 0x6d6   : > { %v1194_v46 = vpop.f32.mrb[12].mxu1 }
 0x6d7   : > { %v1195_v47 = vadd.f32 %v1485_v45, %v1194_v46  ;;  %v1603_v48 = vpop.f32.mrb[13].mxu1 }
 0x6d9   : > { %v2069_v49 = vadd.f32 %v1195_v47, %v1953_v0  ;;  %v1213_v0 = vld [vmem:[%s2204_s5 + $0x8] sm:$0xff] }
 0x6da   : > { %v1663_v56 = vpack.c.bf16 %v1213_v0, %v1212_v55 }
 0x6db   : > { %v1199_v50 = vsel %vm329_vm0, %v2069_v49, 0.0 }
 0x6dc   : > { %1200 = vadd.xlane.f32.xlu1 %v1199_v50  ;;  %1664 = vmatpush3.bf16.msra.mxu1 %v1663_v56 }
 0x6dd   : > { %1665 = vmatprep.subr.bf16.mxu1 %v1832_v10  ;;  %v1487_v10 = vld [vmem:[%s2205_s6] ss:$0 sm:$0xff] }
 0x6e0   : > { %1667 = vmatpush3.bf16.msra.mxu1 %v1666_v59 }
 0x769   : > { %v1201_v51 = vpop.xlane.xlu1 %1200 }
 0x76a   : > { %v1202_v52 = vmul.f32 0.03125, %v1201_v51 }
 0x76c   : > { %v1203_v53 = vsub.f32 %v2069_v49, %v1202_v52 }
 0x76e   : > { %v1204_v54 = vmul.f32 %v1203_v53, %v1203_v53 }
 0x770   : > { %v1205_v13 = vsel %vm329_vm0, %v1204_v54, 0.0 }
 0x771   : > { %1206 = vadd.xlane.f32.xlu0 %v1205_v13 }
 0x7fe   : > { %v1207_v20 = vpop.xlane.xlu0 %1206 }
 0x7ff   : > { %v1208_v21 = vmul.f32 0.03125, %v1207_v20 }
 0x801   : > { %v1209_v22 = vadd.f32 1e-05, %v1208_v21 }
 0x803   : > { %1766 = vrsqrt.f32 %v1209_v22 }
 0x80d   : > { %v1767_v23 = vpop.eup %1766 }
 0x80e   : > { %v1211_v24 = vmul.f32 %v1767_v23, %v1203_v53 }
 0x810   : > { %1613 = vmatmul.mubr.msk.f32.vlgmr.msra.gmra.mrb[14].mxu1 %vm329_vm0, %v1211_v24 }
 0x8e3   : > { %v1292_v28 = vpop.f32.mrb[14].mxu1 }
 0x8e4   : > { %v1293_v29 = vadd.f32 %v1487_v10, %v1292_v28  ;;  %v1614_v30 = vpop.f32.mrb[15].mxu1 }
 0x8e6   : > { %v1296_v31 = vmax.f32 %v1293_v29, 0.0 }
 0x8e8   : > { %1648 = vmatmul.mubr.f32.vlgmr.msra.gmra.mrb[6].mxu0 %v1296_v31 }
 0x9bb   : > { %v1386_v33 = vpop.f32.mrb[6].mxu0 }
 0x9bc   : > { %v1387_v34 = vadd.f32 %v1489_v32, %v1386_v33  ;;  %v1649_v35 = vpop.f32.mrb[7].mxu0 }
 0x9be   : > { %v1390_v36 = vadd.f32 %v1387_v34, %v2069_v49 }
 0x9c0   : > { %1391 = vst.msk [vmem:[%s323_s23] sm:$0xff] %vm329_vm0, %v1390_v36 }
 0x9c1   : > { %1781 = shalt.err (!%p1778_p3)
}
 0x9c2   : > { %s1782_s14 = scalar_lea.hbm %s2156_s27, 128  ;;  %s1786_s23 = scalar_lea.hbm %s2208_s9, 256 }
 0x9c3   : > { %p1783_p4 = scmp.ne.s32.totalorder %s2156_s27, %s1782_s14  ;;  %p1787_p9 = scmp.lt.u32.totalorder %s2156_s27, %s2208_s9 }
 0x9c4   : > { %p1788_p10 = scmp.lt.u32.totalorder %s1786_s23, %s1782_s14  ;;  %p1790_p12 = scmp.lt.u32.totalorder %s1782_s14, %s2156_s27 }
 0x9c5   : > { %p1784_p7 = pnand %p1783_p4, %p1938_p5 }
 0x9c6   : > { %p1789_p11 = por %p1788_p10, %p1787_p9 }
 0x9c7   : > { %p1785_p8 = pneg %p1784_p7 }
 0x9c8   : > { %p1791_p13 = por %p1790_p12, %p1789_p11 }
 0x9ca   : > { %p1792_p0 = pnand %p1791_p13, %p1785_p8 }
 0x9cc   : > { %1795 = shalt.err (!%p1792_p0)
}
 0x9cd   : > { %1692 = dma.vmem_to_hbm [thread:$0]  (%p1938_p5), %s2158_s24, 128, %s2156_s27, %s1393_s28  }
 0x9ce PF: > { %p1698_p1 = scmp.ge.s32.totalorder %s1830_s12, 2  ;;  %s1418_s13 = sand.u32 1, %s1818_s30  }
 0x9cf   : > { %s1419_s29 = scalar_lea.sflag [#allocation3], %s1418_s13 }
 0x9d0   : > { %p1695_p2 = pnand %p1698_p1, %p1942_p6 }
 0x9d2   : > { %1813 = dma.done.wait (!%p1695_p2), %s1419_s29, 128  }
 0x9d3   : > { %1815 = vsyncadd (!%p1695_p2), %s1419_s29, 4294967168  ;;  %p19_p3 = scmp.ge.s32.totalorder %s1925_s15, 4   ;;  %s2211_s30 = smov %s1822_s10 }
 0x9d4   : > { %s2212_s10 = smov %s1826_s11  ;;  %s2213_s11 = smov %s1936_s18 }
 0x9d5   : > { %s2214_s12 = smov %s1925_s15  ;;  %21 = sbr.rel (!%p19_p3) target bundleno = 3 (0x3), region = 91 }
 0x9dc   :  { %1424 = vsyncpa [#allocation3], 1 }
 0x9dd   :  { %1426 = vsyncpa [#allocation3 + $0x1], 1 }

</bundles_post_ra>
